<compile_context>
chip_gen: v7x
topology: tpu7x:2x2x1
jax: 0.10.0
libtpu: 0.0.40
codegen_flags: <defaults>
</compile_context>

<pallas_src>
import jax
import jax.numpy as jnp
from jax.experimental import pallas as pl
from jax.experimental.pallas import tpu as pltpu


def _round_up(x, m):
    return ((x + m - 1) // m) * m


def _pick_tile(n_pad, candidates):
    for c in candidates:
        if n_pad % c == 0:
            return c
    return 128


def _vmem_limit_bytes():
    # Generation-aware scoped-VMEM budget (~85% of per-TensorCore VMEM).
    try:
        cap = int(pltpu.get_tpu_info().vmem_capacity_bytes)
    except Exception:
        cap = 64 * 1024 * 1024          # conservative (v7x-sized) fallback
    return int(cap * 0.85)


# ----------------------------------------------------------------------------
# Layer-1 kernel:  G1[i,:] = relu(A[i,:] @ XW + b1) @ W2          (XW = X @ W1)
#   grid = (row-tile i [parallel], k-tile k [arbitrary / reduction])
# ----------------------------------------------------------------------------
def _gcn_layer1_kernel(xw_ref, b1_ref, w2_ref, a_ref, g1_ref, acc_ref):
    k = pl.program_id(1)

    @pl.when(k == 0)
    def _():
        acc_ref[...] = jnp.zeros_like(acc_ref)

    acc_ref[...] += jnp.dot(a_ref[...], xw_ref[...],
                            preferred_element_type=jnp.float32)

    @pl.when(k == pl.num_programs(1) - 1)
    def _():
        h1 = jnp.maximum(acc_ref[...] + b1_ref[...], 0.0)
        g1 = jnp.dot(h1.astype(jnp.bfloat16), w2_ref[...],
                     preferred_element_type=jnp.float32)
        g1_ref[...] = g1.astype(g1_ref.dtype)


# ----------------------------------------------------------------------------
# Layer-2 + decoder-projection kernel:
#   H[i,:]  = tanh(A[i,:] @ G1 + b2)
#   SD[i,:] = H[i,:] @ [W_src | W_dst | 0...] + [b_dec | 0...]    (lane-dense)
# ----------------------------------------------------------------------------
def _gcn_layer2_kernel(g1_ref, b2_ref, wp_ref, bp_ref, a_ref, sd_ref, acc_ref):
    k = pl.program_id(1)

    @pl.when(k == 0)
    def _():
        acc_ref[...] = jnp.zeros_like(acc_ref)

    acc_ref[...] += jnp.dot(a_ref[...], g1_ref[...],
                            preferred_element_type=jnp.float32)

    @pl.when(k == pl.num_programs(1) - 1)
    def _():
        h = jnp.tanh(acc_ref[...] + b2_ref[...])
        sd = jnp.dot(h.astype(jnp.bfloat16), wp_ref[...],
                     preferred_element_type=jnp.float32) + bp_ref[...]
        sd_ref[...] = sd.astype(sd_ref.dtype)


# ----------------------------------------------------------------------------
# InfEncDec wrapper (mirrors the PyTorch forward semantics)
# ----------------------------------------------------------------------------
class InfEncDec:
    def __init__(self, enc_params, dec_params):
        self.enc_params = enc_params   # (W1, b1, W2, b2)
        self.dec_params = dec_params   # (W_src, W_dst, b)

    # --- encoder + per-node decoder projections: two parallel-markable calls ---
    def encode_project(self, graph, feat):
        w1, b1, w2, b2 = self.enc_params
        w_src, w_dst, b_dec = self.dec_params
        n = graph.shape[0]
        f_in, hid = w1.shape
        out = w2.shape[1]
        bf16 = jnp.bfloat16

        n_pad = _round_up(n, 128)
        f_pad = _round_up(f_in, 128)
        hid_pad = _round_up(hid, 128)
        out_pad = _round_up(out, 128)

        # Small-N fast path: tiles shrink to 128 so the demo is a single grid step;
        # large N gets 256-row / 512-col A tiles (MXU-native on v6e/v7x, 2x128 on v5e).
        tile_m = _pick_tile(n_pad, (256, 128))
        tile_k = _pick_tile(n_pad, (512, 256, 128))
        ni = n_pad // tile_m
        nk = n_pad // tile_k

        # Padded operands (see padding invariant in the header comment).
        a_p = jnp.zeros((n_pad, n_pad), bf16).at[:n, :n].set(graph.astype(bf16))
        x_p = jnp.zeros((n_pad, f_pad), bf16).at[:n, :f_in].set(feat.astype(bf16))
        w1_p = jnp.zeros((f_pad, hid_pad), bf16).at[:f_in, :hid].set(w1.astype(bf16))
        b1_p = jnp.zeros((1, hid_pad), jnp.float32).at[0, :hid].set(b1)
        w2_p = jnp.zeros((hid_pad, out_pad), bf16).at[:hid, :out].set(w2.astype(bf16))
        b2_p = jnp.zeros((1, out_pad), jnp.float32).at[0, :out].set(b2)
        # Decoder projection packed lane-dense, bf16 (single-pass MXU):
        #   lane 0 -> W_src (+ bias folded in via bp lane 0), lane 1 -> W_dst.
        wp = (jnp.zeros((out_pad, 128), bf16)
              .at[:out, 0].set(w_src[:, 0].astype(bf16))
              .at[:out, 1].set(w_dst[:, 0].astype(bf16)))
        bp = jnp.zeros((1, 128), jnp.float32).at[0, 0].set(b_dec[0])

        # XW = X @ W1 hoisted out of the kernel (tiny; one XLA matmul) and streamed
        # k-tiled -> frees the full-X / XW residency inside the kernel.
        xw_p = jnp.dot(x_p, w1_p, preferred_element_type=jnp.float32).astype(bf16)

        vmem_limit = _vmem_limit_bytes()

        # A stream: triple-buffer only when the k loop is long enough that the
        # k==nk-1 epilogue (relu@W2 / tanh+projection) would otherwise stall DMA.
        if nk >= 3:
            a_spec = pl.BlockSpec((tile_m, tile_k), lambda i, k: (i, k),
                                  pipeline_mode=pl.Buffered(3))
        else:
            a_spec = pl.BlockSpec((tile_m, tile_k), lambda i, k: (i, k))

        # ---------------- layer 1:  G1 = relu(A @ XW + b1) @ W2 ----------------
        g1 = pl.pallas_call(
            _gcn_layer1_kernel,
            out_shape=jax.ShapeDtypeStruct((n_pad, out_pad), bf16),
            grid_spec=pltpu.PrefetchScalarGridSpec(
                num_scalar_prefetch=0,
                grid=(ni, nk),
                in_specs=[
                    pl.BlockSpec((tile_k, hid_pad), lambda i, k: (k, 0)),   # XW k-tile
                    pl.BlockSpec((1, hid_pad), lambda i, k: (0, 0)),        # b1
                    pl.BlockSpec((hid_pad, out_pad), lambda i, k: (0, 0)),  # W2
                    a_spec,                                                 # A tile
                ],
                out_specs=pl.BlockSpec((tile_m, out_pad), lambda i, k: (i, 0)),
                scratch_shapes=[pltpu.VMEM((tile_m, hid_pad), jnp.float32)],
            ),
            compiler_params=pltpu.CompilerParams(
                dimension_semantics=("parallel", "arbitrary"),
                vmem_limit_bytes=vmem_limit),
        )(xw_p, b1_p, w2_p, a_p)

        # ------ layer 2 + decoder projections (lane-dense SD output) ------
        sd_full = pl.pallas_call(
            _gcn_layer2_kernel,
            out_shape=jax.ShapeDtypeStruct((n_pad, 128), jnp.float32),
            grid_spec=pltpu.PrefetchScalarGridSpec(
                num_scalar_prefetch=0,
                grid=(ni, nk),
                in_specs=[
                    pl.BlockSpec((tile_k, out_pad), lambda i, k: (k, 0)),   # G1 k-tile
                    pl.BlockSpec((1, out_pad), lambda i, k: (0, 0)),        # b2
                    pl.BlockSpec((out_pad, 128), lambda i, k: (0, 0)),      # W_proj
                    pl.BlockSpec((1, 128), lambda i, k: (0, 0)),            # b_proj
                    a_spec,                                                 # A tile
                ],
                out_specs=pl.BlockSpec((tile_m, 128), lambda i, k: (i, 0)),
                scratch_shapes=[pltpu.VMEM((tile_m, out_pad), jnp.float32)],
            ),
            compiler_params=pltpu.CompilerParams(
                dimension_semantics=("parallel", "arbitrary"),
                vmem_limit_bytes=vmem_limit),
        )(g1, b2_p, wp, bp, a_p)

        # (N, 2): col 0 = h @ W_src + b_dec,  col 1 = h @ W_dst
        return sd_full[:n, :2]

    # --- edge decode: sigmoid(s[src] + d[dst]); left to XLA so it fuses with the
    #     gathers (per perf review: a Pallas kernel at E~24 is pure launch overhead).
    # TODO(synk): for very large E, reshape the edge slab to (E_pad//128, 128) and
    # use a lane-dense Pallas elementwise kernel instead.
    def decode(self, graph_edges, sd):
        src, dst = graph_edges
        s = jnp.take(sd[:, 0], src.astype(jnp.int32))
        d = jnp.take(sd[:, 1], dst.astype(jnp.int32))
        return jax.nn.sigmoid(s + d).reshape(-1, 1)

    def __call__(self, graph, feat, inf_graph, neg_graph=None):
        sd = self.encode_project(graph, feat)
        pos = self.decode(inf_graph, sd)
        if neg_graph is None:
            return pos, pos                # identical to decoding inf_graph twice
        return pos, self.decode(neg_graph, sd)


# ----------------------------------------------------------------------------
# Deterministic setup + run
# ----------------------------------------------------------------------------
def normalized_adjacency(key, n):
    a = (jax.random.uniform(key, (n, n)) > 0.7).astype(jnp.float32)
    a = jnp.maximum(a, a.T)
    a = a + jnp.eye(n, dtype=jnp.float32)
    deg = jnp.sum(a, axis=1)
    d_inv_sqrt = 1.0 / jnp.sqrt(deg)
    return a * d_inv_sqrt[:, None] * d_inv_sqrt[None, :]


if __name__ == "__main__":
    N, F_IN, HID, OUT, E = 16, 8, 32, 16, 24

    key = jax.random.PRNGKey(0)
    (k_adj, k_feat, k_w1, k_w2, k_ws, k_wd,
     k_e1, k_e2, k_e3, k_e4) = jax.random.split(key, 10)

    graph = normalized_adjacency(k_adj, N)
    feat = jax.random.normal(k_feat, (N, F_IN), dtype=jnp.float32)

    # encoder parameters (2-layer GCN)
    w1 = jax.random.normal(k_w1, (F_IN, HID), dtype=jnp.float32) * 0.1
    b1 = jnp.zeros((HID,), dtype=jnp.float32)
    w2 = jax.random.normal(k_w2, (HID, OUT), dtype=jnp.float32) * 0.1
    b2 = jnp.zeros((OUT,), dtype=jnp.float32)

    # decoder parameters: Linear(2*OUT -> 1) split into src/dst halves, + Sigmoid
    w_src = jax.random.normal(k_ws, (OUT, 1), dtype=jnp.float32) * 0.1
    w_dst = jax.random.normal(k_wd, (OUT, 1), dtype=jnp.float32) * 0.1
    b_dec = jnp.zeros((1,), dtype=jnp.float32)

    inf_graph = (jax.random.randint(k_e1, (E,), 0, N, dtype=jnp.int32),
                 jax.random.randint(k_e2, (E,), 0, N, dtype=jnp.int32))
    neg_graph = (jax.random.randint(k_e3, (E,), 0, N, dtype=jnp.int32),
                 jax.random.randint(k_e4, (E,), 0, N, dtype=jnp.int32))

    model = InfEncDec((w1, b1, w2, b2), (w_src, w_dst, b_dec))

    fwd = jax.jit(model.__call__)
    pos_scores, neg_scores = fwd(graph, feat, inf_graph, neg_graph)
    jax.block_until_ready((pos_scores, neg_scores))

    # pure-JAX f32 reference (kernel feeds the MXU bf16 inputs -> loose tolerance)
    h1_ref = jnp.maximum(graph @ (feat @ w1) + b1, 0.0)
    h_ref = jnp.tanh(graph @ (h1_ref @ w2) + b2)

    def ref_decode(g):
        src, dst = g
        return jax.nn.sigmoid(h_ref[src] @ w_src + h_ref[dst] @ w_dst + b_dec)

    pos_ref = ref_decode(inf_graph)
    neg_ref = ref_decode(neg_graph)

    assert pos_scores.shape == (E, 1) and neg_scores.shape == (E, 1)
    assert bool(jnp.all(jnp.isfinite(pos_scores))) and bool(jnp.all(jnp.isfinite(neg_scores)))
    assert bool(jnp.allclose(pos_scores, pos_ref, atol=5e-2))
    assert bool(jnp.allclose(neg_scores, neg_ref, atol=5e-2))

    print("KERNEL_OK")
</pallas_src>

<mosaic_0001>
module attributes {stable_mosaic.version = 11 : i64} {
  func.func @_gcn_layer1_kernel(%arg0: i32, %arg1: i32, %arg2: memref<128x128xbf16, #tpu.memory_space<vmem>>, %arg3: memref<1x128xf32, #tpu.memory_space<vmem>>, %arg4: memref<128x128xbf16, #tpu.memory_space<vmem>>, %arg5: memref<128x128xbf16, #tpu.memory_space<vmem>>, %arg6: memref<128x128xbf16, #tpu.memory_space<vmem>>, %arg7: memref<128x128xf32, #tpu.memory_space<vmem>>) attributes {dimension_semantics = [#tpu.dimension_semantics<parallel>, #tpu.dimension_semantics<arbitrary>], iteration_bounds = array<i64: 1, 1>, scalar_prefetch = 0 : i64, scratch_operands = 1 : i64, tpu.core_type = #tpu.core_type<tc>, window_params = [{transform_indices = @transform_0, window_bounds = array<i64: 128, 128>}, {pipeline_mode = #tpu.pipeline_mode<synchronous>, transform_indices = @transform_1, window_bounds = array<i64: 1, 128>}, {pipeline_mode = #tpu.pipeline_mode<synchronous>, transform_indices = @transform_2, window_bounds = array<i64: 128, 128>}, {transform_indices = @transform_3, window_bounds = array<i64: 128, 128>}, {transform_indices = @transform_4, window_bounds = array<i64: 128, 128>}]} {
    %c0_i32 = arith.constant 0 : i32
    %0 = arith.cmpi eq, %arg1, %c0_i32 : i32
    %1 = arith.extui %0 : i1 to i32
    %c0_i32_0 = arith.constant 0 : i32
    %2 = arith.cmpi ne, %1, %c0_i32_0 : i32
    scf.if %2 {
      %cst_10 = arith.constant 0.000000e+00 : f32
      %12 = vector.broadcast %cst_10 : f32 to vector<128x128xf32>
      %c0_11 = arith.constant 0 : index
      %c0_12 = arith.constant 0 : index
      %13 = vector.load %arg7[%c0_11, %c0_12] : memref<128x128xf32, #tpu.memory_space<vmem>>, vector<128x128xf32>
      tpu.vector_store %arg7[%c0_11, %c0_12], %12 {strides = array<i32>} : memref<128x128xf32, #tpu.memory_space<vmem>>, vector<128x128xf32>,
    } else {
    }
    %c0 = arith.constant 0 : index
    %c0_1 = arith.constant 0 : index
    %3 = vector.load %arg7[%c0, %c0_1] : memref<128x128xf32, #tpu.memory_space<vmem>>, vector<128x128xf32>
    %c0_2 = arith.constant 0 : index
    %c0_3 = arith.constant 0 : index
    %4 = vector.load %arg5[%c0_2, %c0_3] : memref<128x128xbf16, #tpu.memory_space<vmem>>, vector<128x128xbf16>
    %c0_4 = arith.constant 0 : index
    %c0_5 = arith.constant 0 : index
    %5 = vector.load %arg2[%c0_4, %c0_5] : memref<128x128xbf16, #tpu.memory_space<vmem>>, vector<128x128xbf16>
    %cst = arith.constant dense<0.000000e+00> : vector<128x128xf32>
    %6 = tpu.matmul %4, %5, %cst {dimension_numbers = #tpu.dot_dimension_numbers<[1], [0], [0], [1], [0, 0, 1, 1], [], []>} : vector<128x128xbf16>, vector<128x128xbf16>, vector<128x128xf32> -> vector<128x128xf32>
    %7 = arith.addf %3, %6 : vector<128x128xf32>
    %c0_6 = arith.constant 0 : index
    %c0_7 = arith.constant 0 : index
    %8 = vector.load %arg7[%c0_6, %c0_7] : memref<128x128xf32, #tpu.memory_space<vmem>>, vector<128x128xf32>
    tpu.vector_store %arg7[%c0_6, %c0_7], %7 {strides = array<i32>} : memref<128x128xf32, #tpu.memory_space<vmem>>, vector<128x128xf32>,
    %c0_i32_8 = arith.constant 0 : i32
    %9 = arith.cmpi eq, %arg1, %c0_i32_8 : i32
    %10 = arith.extui %9 : i1 to i32
    %c0_i32_9 = arith.constant 0 : i32
    %11 = arith.cmpi ne, %10, %c0_i32_9 : i32
    scf.if %11 {
      %c0_10 = arith.constant 0 : index
      %c0_11 = arith.constant 0 : index
      %12 = vector.load %arg7[%c0_10, %c0_11] : memref<128x128xf32, #tpu.memory_space<vmem>>, vector<128x128xf32>
      %c0_12 = arith.constant 0 : index
      %c0_13 = arith.constant 0 : index
      %13 = vector.load %arg3[%c0_12, %c0_13] : memref<1x128xf32, #tpu.memory_space<vmem>>, vector<1x128xf32>
      %14 = vector.broadcast %13 : vector<1x128xf32> to vector<128x128xf32>
      %15 = arith.addf %12, %14 : vector<128x128xf32>
      %cst_14 = arith.constant 0.000000e+00 : f32
      %16 = vector.broadcast %cst_14 : f32 to vector<128x128xf32>
      %17 = arith.maximumf %15, %16 : vector<128x128xf32>
      %18 = arith.truncf %17 : vector<128x128xf32> to vector<128x128xbf16>
      %c0_15 = arith.constant 0 : index
      %c0_16 = arith.constant 0 : index
      %19 = vector.load %arg4[%c0_15, %c0_16] : memref<128x128xbf16, #tpu.memory_space<vmem>>, vector<128x128xbf16>
      %cst_17 = arith.constant dense<0.000000e+00> : vector<128x128xf32>
      %20 = tpu.matmul %18, %19, %cst_17 {dimension_numbers = #tpu.dot_dimension_numbers<[1], [0], [0], [1], [0, 0, 1, 1], [], []>} : vector<128x128xbf16>, vector<128x128xbf16>, vector<128x128xf32> -> vector<128x128xf32>
      %21 = arith.truncf %20 : vector<128x128xf32> to vector<128x128xbf16>
      %c0_18 = arith.constant 0 : index
      %c0_19 = arith.constant 0 : index
      %22 = vector.load %arg6[%c0_18, %c0_19] : memref<128x128xbf16, #tpu.memory_space<vmem>>, vector<128x128xbf16>
      tpu.vector_store %arg6[%c0_18, %c0_19], %21 {strides = array<i32>} : memref<128x128xbf16, #tpu.memory_space<vmem>>, vector<128x128xbf16>,
    } else {
    }
    return
  }
  func.func @transform_0(%arg0: i32, %arg1: i32) -> (i32, i32) {
    %c0_i32 = arith.constant 0 : i32
    %c0_i32_0 = arith.constant 0 : i32
    return %arg1, %c0_i32 : i32, i32
  }
  func.func @transform_1(%arg0: i32, %arg1: i32) -> (i32, i32) {
    %c0_i32 = arith.constant 0 : i32
    %c0_i32_0 = arith.constant 0 : i32
    %c0_i32_1 = arith.constant 0 : i32
    return %c0_i32, %c0_i32_0 : i32, i32
  }
  func.func @transform_2(%arg0: i32, %arg1: i32) -> (i32, i32) {
    %c0_i32 = arith.constant 0 : i32
    %c0_i32_0 = arith.constant 0 : i32
    %c0_i32_1 = arith.constant 0 : i32
    return %c0_i32, %c0_i32_0 : i32, i32
  }
  func.func @transform_3(%arg0: i32, %arg1: i32) -> (i32, i32) {
    %c0_i32 = arith.constant 0 : i32
    return %arg0, %arg1 : i32, i32
  }
  func.func @transform_4(%arg0: i32, %arg1: i32) -> (i32, i32) {
    %c0_i32 = arith.constant 0 : i32
    %c0_i32_0 = arith.constant 0 : i32
    return %arg0, %c0_i32 : i32, i32
  }
}

module attributes {stable_mosaic.version = 11 : i64} {
  func.func @_gcn_layer2_kernel(%arg0: i32, %arg1: i32, %arg2: memref<128x128xbf16, #tpu.memory_space<vmem>>, %arg3: memref<1x128xf32, #tpu.memory_space<vmem>>, %arg4: memref<128x128xbf16, #tpu.memory_space<vmem>>, %arg5: memref<1x128xf32, #tpu.memory_space<vmem>>, %arg6: memref<128x128xbf16, #tpu.memory_space<vmem>>, %arg7: memref<128x128xf32, #tpu.memory_space<vmem>>, %arg8: memref<128x128xf32, #tpu.memory_space<vmem>>) attributes {dimension_semantics = [#tpu.dimension_semantics<parallel>, #tpu.dimension_semantics<arbitrary>], iteration_bounds = array<i64: 1, 1>, scalar_prefetch = 0 : i64, scratch_operands = 1 : i64, tpu.core_type = #tpu.core_type<tc>, window_params = [{transform_indices = @transform_0, window_bounds = array<i64: 128, 128>}, {pipeline_mode = #tpu.pipeline_mode<synchronous>, transform_indices = @transform_1, window_bounds = array<i64: 1, 128>}, {pipeline_mode = #tpu.pipeline_mode<synchronous>, transform_indices = @transform_2, window_bounds = array<i64: 128, 128>}, {pipeline_mode = #tpu.pipeline_mode<synchronous>, transform_indices = @transform_3, window_bounds = array<i64: 1, 128>}, {transform_indices = @transform_4, window_bounds = array<i64: 128, 128>}, {transform_indices = @transform_5, window_bounds = array<i64: 128, 128>}]} {
    %c0_i32 = arith.constant 0 : i32
    %0 = arith.cmpi eq, %arg1, %c0_i32 : i32
    %1 = arith.extui %0 : i1 to i32
    %c0_i32_0 = arith.constant 0 : i32
    %2 = arith.cmpi ne, %1, %c0_i32_0 : i32
    scf.if %2 {
      %cst_10 = arith.constant 0.000000e+00 : f32
      %12 = vector.broadcast %cst_10 : f32 to vector<128x128xf32>
      %c0_11 = arith.constant 0 : index
      %c0_12 = arith.constant 0 : index
      %13 = vector.load %arg8[%c0_11, %c0_12] : memref<128x128xf32, #tpu.memory_space<vmem>>, vector<128x128xf32>
      tpu.vector_store %arg8[%c0_11, %c0_12], %12 {strides = array<i32>} : memref<128x128xf32, #tpu.memory_space<vmem>>, vector<128x128xf32>,
    } else {
    }
    %c0 = arith.constant 0 : index
    %c0_1 = arith.constant 0 : index
    %3 = vector.load %arg8[%c0, %c0_1] : memref<128x128xf32, #tpu.memory_space<vmem>>, vector<128x128xf32>
    %c0_2 = arith.constant 0 : index
    %c0_3 = arith.constant 0 : index
    %4 = vector.load %arg6[%c0_2, %c0_3] : memref<128x128xbf16, #tpu.memory_space<vmem>>, vector<128x128xbf16>
    %c0_4 = arith.constant 0 : index
    %c0_5 = arith.constant 0 : index
    %5 = vector.load %arg2[%c0_4, %c0_5] : memref<128x128xbf16, #tpu.memory_space<vmem>>, vector<128x128xbf16>
    %cst = arith.constant dense<0.000000e+00> : vector<128x128xf32>
    %6 = tpu.matmul %4, %5, %cst {dimension_numbers = #tpu.dot_dimension_numbers<[1], [0], [0], [1], [0, 0, 1, 1], [], []>} : vector<128x128xbf16>, vector<128x128xbf16>, vector<128x128xf32> -> vector<128x128xf32>
    %7 = arith.addf %3, %6 : vector<128x128xf32>
    %c0_6 = arith.constant 0 : index
    %c0_7 = arith.constant 0 : index
    %8 = vector.load %arg8[%c0_6, %c0_7] : memref<128x128xf32, #tpu.memory_space<vmem>>, vector<128x128xf32>
    tpu.vector_store %arg8[%c0_6, %c0_7], %7 {strides = array<i32>} : memref<128x128xf32, #tpu.memory_space<vmem>>, vector<128x128xf32>,
    %c0_i32_8 = arith.constant 0 : i32
    %9 = arith.cmpi eq, %arg1, %c0_i32_8 : i32
    %10 = arith.extui %9 : i1 to i32
    %c0_i32_9 = arith.constant 0 : i32
    %11 = arith.cmpi ne, %10, %c0_i32_9 : i32
    scf.if %11 {
      %c0_10 = arith.constant 0 : index
      %c0_11 = arith.constant 0 : index
      %12 = vector.load %arg8[%c0_10, %c0_11] : memref<128x128xf32, #tpu.memory_space<vmem>>, vector<128x128xf32>
      %c0_12 = arith.constant 0 : index
      %c0_13 = arith.constant 0 : index
      %13 = vector.load %arg3[%c0_12, %c0_13] : memref<1x128xf32, #tpu.memory_space<vmem>>, vector<1x128xf32>
      %14 = vector.broadcast %13 : vector<1x128xf32> to vector<128x128xf32>
      %15 = arith.addf %12, %14 : vector<128x128xf32>
      %16 = math.tanh %15 : vector<128x128xf32>
      %17 = arith.truncf %16 : vector<128x128xf32> to vector<128x128xbf16>
      %c0_14 = arith.constant 0 : index
      %c0_15 = arith.constant 0 : index
      %18 = vector.load %arg4[%c0_14, %c0_15] : memref<128x128xbf16, #tpu.memory_space<vmem>>, vector<128x128xbf16>
      %cst_16 = arith.constant dense<0.000000e+00> : vector<128x128xf32>
      %19 = tpu.matmul %17, %18, %cst_16 {dimension_numbers = #tpu.dot_dimension_numbers<[1], [0], [0], [1], [0, 0, 1, 1], [], []>} : vector<128x128xbf16>, vector<128x128xbf16>, vector<128x128xf32> -> vector<128x128xf32>
      %c0_17 = arith.constant 0 : index
      %c0_18 = arith.constant 0 : index
      %20 = vector.load %arg5[%c0_17, %c0_18] : memref<1x128xf32, #tpu.memory_space<vmem>>, vector<1x128xf32>
      %21 = vector.broadcast %20 : vector<1x128xf32> to vector<128x128xf32>
      %22 = arith.addf %19, %21 : vector<128x128xf32>
      %c0_19 = arith.constant 0 : index
      %c0_20 = arith.constant 0 : index
      %23 = vector.load %arg7[%c0_19, %c0_20] : memref<128x128xf32, #tpu.memory_space<vmem>>, vector<128x128xf32>
      tpu.vector_store %arg7[%c0_19, %c0_20], %22 {strides = array<i32>} : memref<128x128xf32, #tpu.memory_space<vmem>>, vector<128x128xf32>,
    } else {
    }
    return
  }
  func.func @transform_0(%arg0: i32, %arg1: i32) -> (i32, i32) {
    %c0_i32 = arith.constant 0 : i32
    %c0_i32_0 = arith.constant 0 : i32
    return %arg1, %c0_i32 : i32, i32
  }
  func.func @transform_1(%arg0: i32, %arg1: i32) -> (i32, i32) {
    %c0_i32 = arith.constant 0 : i32
    %c0_i32_0 = arith.constant 0 : i32
    %c0_i32_1 = arith.constant 0 : i32
    return %c0_i32, %c0_i32_0 : i32, i32
  }
  func.func @transform_2(%arg0: i32, %arg1: i32) -> (i32, i32) {
    %c0_i32 = arith.constant 0 : i32
    %c0_i32_0 = arith.constant 0 : i32
    %c0_i32_1 = arith.constant 0 : i32
    return %c0_i32, %c0_i32_0 : i32, i32
  }
  func.func @transform_3(%arg0: i32, %arg1: i32) -> (i32, i32) {
    %c0_i32 = arith.constant 0 : i32
    %c0_i32_0 = arith.constant 0 : i32
    %c0_i32_1 = arith.constant 0 : i32
    return %c0_i32, %c0_i32_0 : i32, i32
  }
  func.func @transform_4(%arg0: i32, %arg1: i32) -> (i32, i32) {
    %c0_i32 = arith.constant 0 : i32
    return %arg0, %arg1 : i32, i32
  }
  func.func @transform_5(%arg0: i32, %arg1: i32) -> (i32, i32) {
    %c0_i32 = arith.constant 0 : i32
    %c0_i32_0 = arith.constant 0 : i32
    return %arg0, %c0_i32 : i32, i32
  }
}

</mosaic_0001>

<bundles_post_ra>
// kernel: a_call__.2
= control target key start
LH: loop header
LB: loop body
LE: loop exit
PB: predicated region body
PF: predicated region fallthrough
CT: control target
= control target key end

     0   :  { %s970_s0 = inlined_call_operand.vmem [shape: bf16[128,128], index: 0, kind: input, shape index: {}]   ;;  %s971_s3 = inlined_call_operand.vmem [shape: bf16[128,128], index: 3, kind: input, shape index: {}]   ;;  %s972_s2 = inlined_call_operand.vmem [shape: bf16[128,128], index: 2, kind: input, shape index: {}]   ;;  %s973_s1 = inlined_call_operand.vmem [shape: f32[1,128], index: 1, kind: input, shape index: {}]   ;;  %s974_s4 = inlined_call_operand.vmem [shape: bf16[128,128], index: 4, kind: output, shape index: {}]  }
   0x1   :  { %v822_v0 = vld [vmem:[%s970_s0] sm:$0xff]   ;;  %v823_v1 = vld [vmem:[%s970_s0 + $0x8] sm:$0xff]   ;;  %v824_v2 = vld [vmem:[%s970_s0 + $0x10] sm:$0xff]  }
   0x2   :  { %758 = vmatprep.subr.bf16.mxu0 %v822_v0  ;;  %v825_v3 = vld [vmem:[%s970_s0 + $0x18] sm:$0xff]   ;;  %v830_v4 = vld [vmem:[%s971_s3] sm:$0xff]   ;;  %v827_v6 = vld [vmem:[%s970_s0 + $0x28] sm:$0xff]  }
   0x3   :  { %759 = vmatpush3.bf16.msra.mxu0 %v822_v0  ;;  %774 = vmatprep.mubr.bf16.mxu0 %v830_v4  ;;  %v826_v5 = vld [vmem:[%s970_s0 + $0x20] sm:$0xff]   ;;  %v839_v8 = vld [vmem:[%s972_s2 + $0x8] sm:$0xff]   ;;  %v828_v9 = vld [vmem:[%s970_s0 + $0x30] sm:$0xff]  }
   0x4   :  { %760 = vmatprep.subr.bf16.mxu0 %v823_v1  ;;  %v838_v7 = vld [vmem:[%s972_s2] sm:$0xff]   ;;  %v840_v10 = vld [vmem:[%s972_s2 + $0x10] sm:$0xff]   ;;  %v829_v11 = vld [vmem:[%s970_s0 + $0x38] sm:$0xff]  }
   0x5   :  { %790 = vmatprep.subr.bf16.mxu1 %v838_v7  ;;  %v841_v12 = vld [vmem:[%s972_s2 + $0x18] sm:$0xff]   ;;  %v842_v13 = vld [vmem:[%s972_s2 + $0x20] sm:$0xff]   ;;  %v831_v14 = vld [vmem:[%s971_s3 + $0x8] sm:$0xff]  }
   0x6   :  { %791 = vmatpush3.bf16.msra.mxu1 %v838_v7  ;;  %v832_v15 = vld [vmem:[%s971_s3 + $0x10] sm:$0xff]   ;;  %v843_v16 = vld [vmem:[%s972_s2 + $0x28] sm:$0xff]   ;;  %v833_v17 = vld [vmem:[%s971_s3 + $0x18] sm:$0xff]  }
   0x7   :  { %761 = vmatpush3.bf16.msra.mxu0 %v823_v1  ;;  %792 = vmatprep.subr.bf16.mxu1 %v839_v8  ;;  %v834_v18 = vld [vmem:[%s971_s3 + $0x20] sm:$0xff]   ;;  %v835_v19 = vld [vmem:[%s971_s3 + $0x28] sm:$0xff]   ;;  %v836_v20 = vld [vmem:[%s971_s3 + $0x30] sm:$0xff]  }
   0x8   :  { %762 = vmatprep.subr.bf16.mxu0 %v824_v2  ;;  %v837_v21 = vld [vmem:[%s971_s3 + $0x38] sm:$0xff]   ;;  %v844_v22 = vld [vmem:[%s972_s2 + $0x30] sm:$0xff]   ;;  %v638_v24 = vld [vmem:[%s973_s1] ss:$0 sm:$0xff] }
   0x9   :  { %v845_v23 = vld [vmem:[%s972_s2 + $0x38] sm:$0xff]  }
   0xa   :  { %793 = vmatpush3.bf16.msra.mxu1 %v839_v8 }
   0xb   :  { %763 = vmatpush3.bf16.msra.mxu0 %v824_v2  ;;  %794 = vmatprep.subr.bf16.mxu1 %v840_v10 }
   0xc   :  { %764 = vmatprep.subr.bf16.mxu0 %v825_v3 }
   0xe   :  { %795 = vmatpush3.bf16.msra.mxu1 %v840_v10 }
   0xf   :  { %765 = vmatpush3.bf16.msra.mxu0 %v825_v3  ;;  %796 = vmatprep.subr.bf16.mxu1 %v841_v12 }
  0x10   :  { %766 = vmatprep.subr.bf16.mxu0 %v826_v5 }
  0x12   :  { %797 = vmatpush3.bf16.msra.mxu1 %v841_v12 }
  0x13   :  { %767 = vmatpush3.bf16.msra.mxu0 %v826_v5  ;;  %798 = vmatprep.subr.bf16.mxu1 %v842_v13 }
  0x14   :  { %768 = vmatprep.subr.bf16.mxu0 %v827_v6 }
  0x16   :  { %799 = vmatpush3.bf16.msra.mxu1 %v842_v13 }
  0x17   :  { %769 = vmatpush3.bf16.msra.mxu0 %v827_v6  ;;  %800 = vmatprep.subr.bf16.mxu1 %v843_v16 }
  0x18   :  { %770 = vmatprep.subr.bf16.mxu0 %v828_v9 }
  0x1a   :  { %801 = vmatpush3.bf16.msra.mxu1 %v843_v16 }
  0x1b   :  { %771 = vmatpush3.bf16.msra.mxu0 %v828_v9  ;;  %802 = vmatprep.subr.bf16.mxu1 %v844_v22 }
  0x1c   :  { %772 = vmatprep.subr.bf16.mxu0 %v829_v11 }
  0x1e   :  { %803 = vmatpush3.bf16.msra.mxu1 %v844_v22 }
  0x1f   :  { %773 = vmatpush3.bf16.msra.mxu0 %v829_v11  ;;  %804 = vmatprep.subr.bf16.mxu1 %v845_v23 }
  0x22   :  { %775 = vmatmul.mubr.bf16.vlgmr.msra.gmra.mrb[0].mxu0 %v831_v14  ;;  %805 = vmatpush3.bf16.msra.mxu1 %v845_v23 }
  0x23   :  { %778 = vmatprep.mubr.bf16.mxu0 %v832_v15 }
  0x2a   :  { %779 = vmatmul.mubr.bf16.gmra.mrb[4].mxu0 %v833_v17 }
  0x2b   :  { %782 = vmatprep.mubr.bf16.mxu0 %v834_v18 }
  0x32   :  { %783 = vmatmul.mubr.bf16.gmra.mrb[8].mxu0 %v835_v19 }
  0x33   :  { %786 = vmatprep.mubr.bf16.mxu0 %v836_v20 }
  0x3a   :  { %787 = vmatmul.mubr.bf16.gmra.mrb[12].mxu0 %v837_v21 }
  0xf5   :  { %v776_v25 = vpop.f32.mrb[0].mxu0 }
  0xf6   :  { %v339_v26 = vadd.f32 %v776_v25, %v638_v24  ;;  %v216_v27 = vpop.f32.mrb[1].mxu0 }
  0xf7   :  { %v337_v28 = vadd.f32 %v638_v24, %v216_v27  ;;  %v777_v29 = vpop.f32.mrb[2].mxu0 }
  0xf8   :  { %v340_v30 = vadd.f32 %v777_v29, %v638_v24  ;;  %v219_v31 = vpop.f32.mrb[3].mxu0  ;;  %v355_v33 = vmax.f32 %v339_v26, 0.0 }
  0xf9   :  { %v338_v32 = vadd.f32 %v638_v24, %v219_v31  ;;  %v353_v35 = vmax.f32 %v337_v28, 0.0 }
  0xfa   :  { %v356_v34 = vmax.f32 %v340_v30, 0.0 }
  0xfb   :  { %v354_v36 = vmax.f32 %v338_v32, 0.0 }
  0xfc   :  { %v370_v37 = vpack.c.bf16 %v356_v34, %v355_v33 }
  0xfd   :  { %v780_v38 = vpop.f32.mrb[4].mxu0  ;;  %v369_v39 = vpack.c.bf16 %v354_v36, %v353_v35 }
  0xfe   :  { %v343_v40 = vadd.f32 %v780_v38, %v638_v24  ;;  %v232_v41 = vpop.f32.mrb[5].mxu0 }
  0xff   :  { %v341_v42 = vadd.f32 %v638_v24, %v232_v41  ;;  %v781_v43 = vpop.f32.mrb[6].mxu0  ;;  %806 = vmatprep.mubr.bf16.mxu1 %v369_v39 }
 0x100   :  { %v344_v44 = vadd.f32 %v781_v43, %v638_v24  ;;  %v235_v45 = vpop.f32.mrb[7].mxu0  ;;  %807 = vmatmul.mubr.bf16.vlgmr.msra.gmra.mrb[0].mxu1 %v370_v37  ;;  %v359_v47 = vmax.f32 %v343_v40, 0.0 }
 0x101   :  { %v342_v46 = vadd.f32 %v638_v24, %v235_v45  ;;  %v357_v49 = vmax.f32 %v341_v42, 0.0 }
 0x102   :  { %v360_v48 = vmax.f32 %v344_v44, 0.0 }
 0x103   :  { %v358_v50 = vmax.f32 %v342_v46, 0.0 }
 0x104   :  { %v372_v51 = vpack.c.bf16 %v360_v48, %v359_v47 }
 0x105   :  { %v371_v52 = vpack.c.bf16 %v358_v50, %v357_v49  ;;  %v784_v53 = vpop.f32.mrb[8].mxu0 }
 0x106   :  { %v347_v54 = vadd.f32 %v784_v53, %v638_v24  ;;  %v248_v55 = vpop.f32.mrb[9].mxu0 }
 0x107   :  { %v345_v56 = vadd.f32 %v638_v24, %v248_v55  ;;  %v785_v57 = vpop.f32.mrb[10].mxu0  ;;  %810 = vmatprep.mubr.bf16.mxu1 %v371_v52 }
 0x108   :  { %v348_v58 = vadd.f32 %v785_v57, %v638_v24  ;;  %v251_v59 = vpop.f32.mrb[11].mxu0  ;;  %811 = vmatmul.mubr.bf16.gmra.mrb[4].mxu1 %v372_v51  ;;  %v363_v61 = vmax.f32 %v347_v54, 0.0 }
 0x109   :  { %v346_v60 = vadd.f32 %v638_v24, %v251_v59  ;;  %v361_v63 = vmax.f32 %v345_v56, 0.0 }
 0x10a   :  { %v364_v62 = vmax.f32 %v348_v58, 0.0 }
 0x10b   :  { %v362_v0 = vmax.f32 %v346_v60, 0.0 }
 0x10c   :  { %v374_v1 = vpack.c.bf16 %v364_v62, %v363_v61 }
 0x10d   :  { %v373_v2 = vpack.c.bf16 %v362_v0, %v361_v63  ;;  %v788_v3 = vpop.f32.mrb[12].mxu0 }
 0x10e   :  { %v351_v4 = vadd.f32 %v788_v3, %v638_v24  ;;  %v264_v5 = vpop.f32.mrb[13].mxu0 }
 0x10f   :  { %v349_v6 = vadd.f32 %v638_v24, %v264_v5  ;;  %v789_v7 = vpop.f32.mrb[14].mxu0  ;;  %814 = vmatprep.mubr.bf16.mxu1 %v373_v2 }
 0x110   :  { %v352_v8 = vadd.f32 %v789_v7, %v638_v24  ;;  %v267_v9 = vpop.f32.mrb[15].mxu0  ;;  %815 = vmatmul.mubr.bf16.gmra.mrb[8].mxu1 %v374_v1  ;;  %v367_v11 = vmax.f32 %v351_v4, 0.0 }
 0x111   :  { %v350_v10 = vadd.f32 %v638_v24, %v267_v9  ;;  %v365_v13 = vmax.f32 %v349_v6, 0.0 }
 0x112   :  { %v368_v12 = vmax.f32 %v352_v8, 0.0 }
 0x113   :  { %v366_v14 = vmax.f32 %v350_v10, 0.0 }
 0x114   :  { %v376_v15 = vpack.c.bf16 %v368_v12, %v367_v11 }
 0x115   :  { %v375_v16 = vpack.c.bf16 %v366_v14, %v365_v13 }
 0x117   :  { %818 = vmatprep.mubr.bf16.mxu1 %v375_v16 }
 0x118   :  { %819 = vmatmul.mubr.bf16.gmra.mrb[12].mxu1 %v376_v15 }
 0x1d3   :  { %v808_v17 = vpop.f32.mrb[0].mxu1 }
 0x1d4   :  { %v475_v18 = vpop.f32.mrb[1].mxu1 }
 0x1d5   :  { %v809_v19 = vpop.f32.mrb[2].mxu1 }
 0x1d6   :  { %v687_v20 = vpack.c.bf16 %v809_v19, %v808_v17  ;;  %v478_v21 = vpop.f32.mrb[3].mxu1 }
 0x1d7   :  { %v682_v22 = vpack.c.bf16 %v478_v21, %v475_v18 }
 0x1d8   :  { %719 = vst [vmem:[%s974_s4 + $0x8] sm:$0xff] %v687_v20  }
 0x1d9   :  { %683 = vst [vmem:[%s974_s4] sm:$0xff] %v682_v22  }
 0x1db   :  { %v812_v23 = vpop.f32.mrb[4].mxu1 }
 0x1dc   :  { %v491_v24 = vpop.f32.mrb[5].mxu1 }
 0x1dd   :  { %v813_v25 = vpop.f32.mrb[6].mxu1 }
 0x1de   :  { %v697_v26 = vpack.c.bf16 %v813_v25, %v812_v23  ;;  %v494_v27 = vpop.f32.mrb[7].mxu1 }
 0x1df   :  { %v692_v28 = vpack.c.bf16 %v494_v27, %v491_v24 }
 0x1e0   :  { %721 = vst [vmem:[%s974_s4 + $0x18] sm:$0xff] %v697_v26  }
 0x1e1   :  { %720 = vst [vmem:[%s974_s4 + $0x10] sm:$0xff] %v692_v28  }
 0x1e3   :  { %v816_v29 = vpop.f32.mrb[8].mxu1 }
 0x1e4   :  { %v507_v30 = vpop.f32.mrb[9].mxu1 }
 0x1e5   :  { %v817_v31 = vpop.f32.mrb[10].mxu1 }
 0x1e6   :  { %v707_v32 = vpack.c.bf16 %v817_v31, %v816_v29  ;;  %v510_v33 = vpop.f32.mrb[11].mxu1 }
 0x1e7   :  { %v702_v34 = vpack.c.bf16 %v510_v33, %v507_v30 }
 0x1e8   :  { %723 = vst [vmem:[%s974_s4 + $0x28] sm:$0xff] %v707_v32  }
 0x1e9   :  { %722 = vst [vmem:[%s974_s4 + $0x20] sm:$0xff] %v702_v34  }
 0x1eb   :  { %v820_v35 = vpop.f32.mrb[12].mxu1 }
 0x1ec   :  { %v523_v36 = vpop.f32.mrb[13].mxu1 }
 0x1ed   :  { %v821_v37 = vpop.f32.mrb[14].mxu1 }
 0x1ee   :  { %v717_v38 = vpack.c.bf16 %v821_v37, %v820_v35  ;;  %v526_v39 = vpop.f32.mrb[15].mxu1 }
 0x1ef   :  { %v712_v40 = vpack.c.bf16 %v526_v39, %v523_v36 }
 0x1f0   :  { %725 = vst [vmem:[%s974_s4 + $0x38] sm:$0xff] %v717_v38  }
 0x1f1   :  { %724 = vst [vmem:[%s974_s4 + $0x30] sm:$0xff] %v712_v40  }

// kernel: a_call__.3
= control target key start
LH: loop header
LB: loop body
LE: loop exit
PB: predicated region body
PF: predicated region fallthrough
CT: control target
= control target key end

     0   :  { %s902_s0 = inlined_call_operand.vmem [shape: bf16[128,128], index: 0, kind: input, shape index: {}]   ;;  %s903_s4 = inlined_call_operand.vmem [shape: bf16[128,128], index: 4, kind: input, shape index: {}]   ;;  %s904_s2 = inlined_call_operand.vmem [shape: bf16[128,128], index: 2, kind: input, shape index: {}]   ;;  %s905_s1 = inlined_call_operand.vmem [shape: f32[1,128], index: 1, kind: input, shape index: {}]   ;;  %s906_s3 = inlined_call_operand.vmem [shape: f32[1,128], index: 3, kind: input, shape index: {}]   ;;  %s907_s5 = inlined_call_operand.vmem [shape: f32[128,128], index: 5, kind: output, shape index: {}]  }
   0x1   :  { %v690_v0 = vld [vmem:[%s902_s0] sm:$0xff]   ;;  %v691_v1 = vld [vmem:[%s902_s0 + $0x8] sm:$0xff]   ;;  %v692_v2 = vld [vmem:[%s902_s0 + $0x10] sm:$0xff]  }
   0x2   :  { %626 = vmatprep.subr.bf16.mxu0 %v690_v0  ;;  %v693_v3 = vld [vmem:[%s902_s0 + $0x18] sm:$0xff]   ;;  %v698_v4 = vld [vmem:[%s903_s4] sm:$0xff]   ;;  %v695_v6 = vld [vmem:[%s902_s0 + $0x28] sm:$0xff]  }
   0x3   :  { %627 = vmatpush3.bf16.msra.mxu0 %v690_v0  ;;  %642 = vmatprep.mubr.bf16.mxu0 %v698_v4  ;;  %v694_v5 = vld [vmem:[%s902_s0 + $0x20] sm:$0xff]   ;;  %v707_v8 = vld [vmem:[%s904_s2 + $0x8] sm:$0xff]   ;;  %v696_v9 = vld [vmem:[%s902_s0 + $0x30] sm:$0xff]  }
   0x4   :  { %628 = vmatprep.subr.bf16.mxu0 %v691_v1  ;;  %v706_v7 = vld [vmem:[%s904_s2] sm:$0xff]   ;;  %v708_v10 = vld [vmem:[%s904_s2 + $0x10] sm:$0xff]   ;;  %v697_v11 = vld [vmem:[%s902_s0 + $0x38] sm:$0xff]  }
   0x5   :  { %658 = vmatprep.subr.bf16.mxu1 %v706_v7  ;;  %v699_v12 = vld [vmem:[%s903_s4 + $0x8] sm:$0xff]   ;;  %v700_v13 = vld [vmem:[%s903_s4 + $0x10] sm:$0xff]   ;;  %v701_v14 = vld [vmem:[%s903_s4 + $0x18] sm:$0xff]  }
   0x6   :  { %659 = vmatpush3.bf16.msra.mxu1 %v706_v7  ;;  %v702_v15 = vld [vmem:[%s903_s4 + $0x20] sm:$0xff]   ;;  %v703_v16 = vld [vmem:[%s903_s4 + $0x28] sm:$0xff]   ;;  %v704_v17 = vld [vmem:[%s903_s4 + $0x30] sm:$0xff]  }
   0x7   :  { %629 = vmatpush3.bf16.msra.mxu0 %v691_v1  ;;  %660 = vmatprep.subr.bf16.mxu1 %v707_v8  ;;  %v705_v18 = vld [vmem:[%s903_s4 + $0x38] sm:$0xff]   ;;  %v710_v20 = vld [vmem:[%s904_s2 + $0x20] sm:$0xff]   ;;  %v711_v21 = vld [vmem:[%s904_s2 + $0x28] sm:$0xff]  }
   0x8   :  { %630 = vmatprep.subr.bf16.mxu0 %v692_v2  ;;  %v709_v19 = vld [vmem:[%s904_s2 + $0x18] sm:$0xff]   ;;  %v712_v22 = vld [vmem:[%s904_s2 + $0x30] sm:$0xff]   ;;  %v584_v24 = vld [vmem:[%s905_s1] ss:$0 sm:$0xff] }
   0x9   :  { %v713_v23 = vld [vmem:[%s904_s2 + $0x38] sm:$0xff]  }
   0xa   :  { %661 = vmatpush3.bf16.msra.mxu1 %v707_v8 }
   0xb   :  { %631 = vmatpush3.bf16.msra.mxu0 %v692_v2  ;;  %662 = vmatprep.subr.bf16.mxu1 %v708_v10 }
   0xc   :  { %632 = vmatprep.subr.bf16.mxu0 %v693_v3 }
   0xe   :  { %663 = vmatpush3.bf16.msra.mxu1 %v708_v10 }
   0xf   :  { %633 = vmatpush3.bf16.msra.mxu0 %v693_v3  ;;  %664 = vmatprep.subr.bf16.mxu1 %v709_v19 }
  0x10   :  { %634 = vmatprep.subr.bf16.mxu0 %v694_v5 }
  0x12   :  { %665 = vmatpush3.bf16.msra.mxu1 %v709_v19 }
  0x13   :  { %635 = vmatpush3.bf16.msra.mxu0 %v694_v5  ;;  %666 = vmatprep.subr.bf16.mxu1 %v710_v20 }
  0x14   :  { %636 = vmatprep.subr.bf16.mxu0 %v695_v6 }
  0x16   :  { %667 = vmatpush3.bf16.msra.mxu1 %v710_v20 }
  0x17   :  { %637 = vmatpush3.bf16.msra.mxu0 %v695_v6  ;;  %668 = vmatprep.subr.bf16.mxu1 %v711_v21 }
  0x18   :  { %638 = vmatprep.subr.bf16.mxu0 %v696_v9 }
  0x1a   :  { %669 = vmatpush3.bf16.msra.mxu1 %v711_v21 }
  0x1b   :  { %639 = vmatpush3.bf16.msra.mxu0 %v696_v9  ;;  %670 = vmatprep.subr.bf16.mxu1 %v712_v22 }
  0x1c   :  { %640 = vmatprep.subr.bf16.mxu0 %v697_v11 }
  0x1e   :  { %671 = vmatpush3.bf16.msra.mxu1 %v712_v22 }
  0x1f   :  { %641 = vmatpush3.bf16.msra.mxu0 %v697_v11  ;;  %672 = vmatprep.subr.bf16.mxu1 %v713_v23 }
  0x22   :  { %643 = vmatmul.mubr.bf16.vlgmr.msra.gmra.mrb[0].mxu0 %v699_v12  ;;  %673 = vmatpush3.bf16.msra.mxu1 %v713_v23 }
  0x23   :  { %646 = vmatprep.mubr.bf16.mxu0 %v700_v13 }
  0x2a   :  { %647 = vmatmul.mubr.bf16.gmra.mrb[4].mxu0 %v701_v14 }
  0x2b   :  { %650 = vmatprep.mubr.bf16.mxu0 %v702_v15 }
  0x32   :  { %651 = vmatmul.mubr.bf16.gmra.mrb[8].mxu0 %v703_v16 }
  0x33   :  { %654 = vmatprep.mubr.bf16.mxu0 %v704_v17  ;;  %v585_v17 = vld [vmem:[%s906_s3] ss:$0 sm:$0xff] }
  0x3a   :  { %655 = vmatmul.mubr.bf16.gmra.mrb[12].mxu0 %v705_v18 }
  0xf5   :  { %v644_v25 = vpop.f32.mrb[0].mxu0 }
  0xf6   :  { %v342_v26 = vadd.f32 %v644_v25, %v584_v24  ;;  %v219_v27 = vpop.f32.mrb[1].mxu0 }
  0xf7   :  { %v340_v28 = vadd.f32 %v584_v24, %v219_v27  ;;  %v645_v29 = vpop.f32.mrb[2].mxu0 }
  0xf8   :  { %714 = vtanh.f32 %v342_v26  ;;  %v343_v30 = vadd.f32 %v645_v29, %v584_v24  ;;  %v222_v31 = vpop.f32.mrb[3].mxu0 }
  0xf9   :  { %716 = vtanh.f32 %v340_v28  ;;  %v341_v32 = vadd.f32 %v584_v24, %v222_v31 }
  0xfa   :  { %718 = vtanh.f32 %v343_v30 }
  0xfb   :  { %720 = vtanh.f32 %v341_v32 }
  0xfd   :  { %v648_v33 = vpop.f32.mrb[4].mxu0 }
  0xfe   :  { %v346_v34 = vadd.f32 %v648_v33, %v584_v24  ;;  %v235_v35 = vpop.f32.mrb[5].mxu0 }
  0xff   :  { %v344_v36 = vadd.f32 %v584_v24, %v235_v35  ;;  %v649_v37 = vpop.f32.mrb[6].mxu0 }
 0x100   :  { %722 = vtanh.f32 %v346_v34  ;;  %v347_v38 = vadd.f32 %v649_v37, %v584_v24  ;;  %v238_v39 = vpop.f32.mrb[7].mxu0 }
 0x101   :  { %724 = vtanh.f32 %v344_v36  ;;  %v345_v40 = vadd.f32 %v584_v24, %v238_v39 }
 0x102   :  { %v715_v41 = vpop.eup %714  ;;  %726 = vtanh.f32 %v347_v38 }
 0x103   :  { %v717_v42 = vpop.eup %716  ;;  %728 = vtanh.f32 %v345_v40 }
 0x104   :  { %v719_v43 = vpop.eup %718 }
 0x105   :  { %v721_v44 = vpop.eup %720  ;;  %v652_v45 = vpop.f32.mrb[8].mxu0  ;;  %v373_v46 = vpack.c.bf16 %v719_v43, %v715_v41 }
 0x106   :  { %v350_v47 = vadd.f32 %v652_v45, %v584_v24  ;;  %v251_v48 = vpop.f32.mrb[9].mxu0  ;;  %v372_v49 = vpack.c.bf16 %v721_v44, %v717_v42 }
 0x107   :  { %v348_v50 = vadd.f32 %v584_v24, %v251_v48  ;;  %v653_v51 = vpop.f32.mrb[10].mxu0 }
 0x108   :  { %730 = vtanh.f32 %v350_v47  ;;  %v351_v52 = vadd.f32 %v653_v51, %v584_v24  ;;  %v254_v53 = vpop.f32.mrb[11].mxu0  ;;  %674 = vmatprep.mubr.bf16.mxu1 %v372_v49 }
 0x109   :  { %732 = vtanh.f32 %v348_v50  ;;  %v349_v54 = vadd.f32 %v584_v24, %v254_v53  ;;  %675 = vmatmul.mubr.bf16.vlgmr.msra.gmra.mrb[0].mxu1 %v373_v46 }
 0x10a   :  { %v723_v55 = vpop.eup %722  ;;  %734 = vtanh.f32 %v351_v52 }
 0x10b   :  { %v725_v56 = vpop.eup %724  ;;  %736 = vtanh.f32 %v349_v54 }
 0x10c   :  { %v727_v57 = vpop.eup %726 }
 0x10d   :  { %v729_v58 = vpop.eup %728  ;;  %v656_v59 = vpop.f32.mrb[12].mxu0  ;;  %v375_v60 = vpack.c.bf16 %v727_v57, %v723_v55 }
 0x10e   :  { %v354_v61 = vadd.f32 %v656_v59, %v584_v24  ;;  %v267_v62 = vpop.f32.mrb[13].mxu0  ;;  %v374_v63 = vpack.c.bf16 %v729_v58, %v725_v56 }
 0x10f   :  { %v352_v0 = vadd.f32 %v584_v24, %v267_v62  ;;  %v657_v1 = vpop.f32.mrb[14].mxu0 }
 0x110   :  { %738 = vtanh.f32 %v354_v61  ;;  %v355_v2 = vadd.f32 %v657_v1, %v584_v24  ;;  %v270_v3 = vpop.f32.mrb[15].mxu0  ;;  %678 = vmatprep.mubr.bf16.mxu1 %v374_v63 }
 0x111   :  { %740 = vtanh.f32 %v352_v0  ;;  %v353_v4 = vadd.f32 %v584_v24, %v270_v3  ;;  %679 = vmatmul.mubr.bf16.gmra.mrb[4].mxu1 %v375_v60 }
 0x112   :  { %v731_v5 = vpop.eup %730  ;;  %742 = vtanh.f32 %v355_v2 }
 0x113   :  { %v733_v6 = vpop.eup %732  ;;  %744 = vtanh.f32 %v353_v4 }
 0x114   :  { %v735_v7 = vpop.eup %734 }
 0x115   :  { %v737_v8 = vpop.eup %736  ;;  %v377_v9 = vpack.c.bf16 %v735_v7, %v731_v5 }
 0x116   :  { %v376_v10 = vpack.c.bf16 %v737_v8, %v733_v6 }
 0x118   :  { %682 = vmatprep.mubr.bf16.mxu1 %v376_v10 }
 0x119   :  { %683 = vmatmul.mubr.bf16.gmra.mrb[8].mxu1 %v377_v9 }
 0x11a   :  { %v739_v11 = vpop.eup %738 }
 0x11b   :  { %v741_v12 = vpop.eup %740 }
 0x11c   :  { %v743_v13 = vpop.eup %742 }
 0x11d   :  { %v745_v14 = vpop.eup %744  ;;  %v379_v15 = vpack.c.bf16 %v743_v13, %v739_v11 }
 0x11e   :  { %v378_v16 = vpack.c.bf16 %v745_v14, %v741_v12 }
 0x120   :  { %686 = vmatprep.mubr.bf16.mxu1 %v378_v16 }
 0x121   :  { %687 = vmatmul.mubr.bf16.gmra.mrb[12].mxu1 %v379_v15 }
 0x1dc   :  { %v676_v18 = vpop.f32.mrb[0].mxu1 }
 0x1dd   :  { %v494_v19 = vadd.f32 %v676_v18, %v585_v17  ;;  %v485_v20 = vpop.f32.mrb[1].mxu1 }
 0x1de   :  { %v486_v21 = vadd.f32 %v585_v17, %v485_v20  ;;  %v677_v22 = vpop.f32.mrb[2].mxu1 }
 0x1df   :  { %550 = vst [vmem:[%s907_s5 + $0x10] sm:$0xff] %v494_v19  ;;  %v497_v23 = vadd.f32 %v677_v22, %v585_v17  ;;  %v488_v24 = vpop.f32.mrb[3].mxu1 }
 0x1e0   :  { %548 = vst [vmem:[%s907_s5] sm:$0xff] %v486_v21  ;;  %v489_v25 = vadd.f32 %v585_v17, %v488_v24 }
 0x1e1   :  { %551 = vst [vmem:[%s907_s5 + $0x18] sm:$0xff] %v497_v23 }
 0x1e2   :  { %549 = vst [vmem:[%s907_s5 + $0x8] sm:$0xff] %v489_v25 }
 0x1e4   :  { %v680_v26 = vpop.f32.mrb[4].mxu1 }
 0x1e5   :  { %v510_v27 = vadd.f32 %v680_v26, %v585_v17  ;;  %v501_v28 = vpop.f32.mrb[5].mxu1 }
 0x1e6   :  { %v502_v29 = vadd.f32 %v585_v17, %v501_v28  ;;  %v681_v30 = vpop.f32.mrb[6].mxu1 }
 0x1e7   :  { %554 = vst [vmem:[%s907_s5 + $0x30] sm:$0xff] %v510_v27  ;;  %v513_v31 = vadd.f32 %v681_v30, %v585_v17  ;;  %v504_v32 = vpop.f32.mrb[7].mxu1 }
 0x1e8   :  { %552 = vst [vmem:[%s907_s5 + $0x20] sm:$0xff] %v502_v29  ;;  %v505_v33 = vadd.f32 %v585_v17, %v504_v32 }
 0x1e9   :  { %555 = vst [vmem:[%s907_s5 + $0x38] sm:$0xff] %v513_v31 }
 0x1ea   :  { %553 = vst [vmem:[%s907_s5 + $0x28] sm:$0xff] %v505_v33 }
 0x1ec   :  { %v684_v34 = vpop.f32.mrb[8].mxu1 }
 0x1ed   :  { %v526_v35 = vadd.f32 %v684_v34, %v585_v17  ;;  %v517_v36 = vpop.f32.mrb[9].mxu1 }
 0x1ee   :  { %v518_v37 = vadd.f32 %v585_v17, %v517_v36  ;;  %v685_v38 = vpop.f32.mrb[10].mxu1 }
 0x1ef   :  { %558 = vst [vmem:[%s907_s5 + $0x50] sm:$0xff] %v526_v35  ;;  %v529_v39 = vadd.f32 %v685_v38, %v585_v17  ;;  %v520_v40 = vpop.f32.mrb[11].mxu1 }
 0x1f0   :  { %556 = vst [vmem:[%s907_s5 + $0x40] sm:$0xff] %v518_v37  ;;  %v521_v41 = vadd.f32 %v585_v17, %v520_v40 }
 0x1f1   :  { %559 = vst [vmem:[%s907_s5 + $0x58] sm:$0xff] %v529_v39 }
 0x1f2   :  { %557 = vst [vmem:[%s907_s5 + $0x48] sm:$0xff] %v521_v41 }
 0x1f4   :  { %v688_v42 = vpop.f32.mrb[12].mxu1 }
 0x1f5   :  { %v542_v43 = vadd.f32 %v688_v42, %v585_v17  ;;  %v533_v44 = vpop.f32.mrb[13].mxu1 }
 0x1f6   :  { %v534_v45 = vadd.f32 %v585_v17, %v533_v44  ;;  %v689_v46 = vpop.f32.mrb[14].mxu1 }
 0x1f7   :  { %562 = vst [vmem:[%s907_s5 + $0x70] sm:$0xff] %v542_v43  ;;  %v545_v47 = vadd.f32 %v689_v46, %v585_v17  ;;  %v536_v48 = vpop.f32.mrb[15].mxu1 }
 0x1f8   :  { %560 = vst [vmem:[%s907_s5 + $0x60] sm:$0xff] %v534_v45  ;;  %v537_v49 = vadd.f32 %v585_v17, %v536_v48 }
 0x1f9   :  { %563 = vst [vmem:[%s907_s5 + $0x78] sm:$0xff] %v545_v47 }
 0x1fa   :  { %561 = vst [vmem:[%s907_s5 + $0x68] sm:$0xff] %v537_v49 }

</bundles_post_ra>
